<compile_context>
chip_gen: v6e
topology: v6e:2x2x1
jax: 0.10.0
libtpu: 0.0.40
codegen_flags: <defaults>
</compile_context>

<pallas_src>
import jax
import jax.numpy as jnp
from jax.experimental import pallas as pl
from jax.experimental.pallas import tpu as pltpu


def _round_up(x, m):
    return (x + m - 1) // m * m


def _vmem_budget_bytes():
    """~84% of physical per-core VMEM (v7x: 64 MiB; v5e/v6e: 128 MiB)."""
    try:
        cap = int(pltpu.get_tpu_info().vmem_capacity_bytes)
    except Exception:
        cap = 64 * 1024 * 1024          # conservative fallback, safe on all gens
    return int(cap * 0.84)


def _row_tile_bytes(tm, D, tf, itm, itw, with_acc):
    """VMEM bytes that scale with the row tile: double-buffered x/out tiles,
    in-kernel temporaries, optional f32 accumulator scratch."""
    b = 2 * tm * D * itm          # x tile, double-buffered
    b += 2 * tm * D * itm         # out tile, double-buffered
    b += tm * tf * 4              # h = relu(x@W1+b1) in f32
    if itw != 4:
        b += tm * tf * itw        # h cast back to weight dtype for 2nd GEMM
    b += tm * D * 4               # f32 result of 2nd GEMM
    if with_acc:
        b += tm * D * 4           # accumulator scratch
    return b


def _ffn_block(x, w1, b1, w2):
    """relu(x @ W1 + b1) @ W2 with f32 MXU accumulation, native-dtype operands."""
    h = jnp.dot(x, w1, preferred_element_type=jnp.float32)
    h = jnp.maximum(h + b1.astype(jnp.float32), 0.0)
    # dropout(p=0.1) in eval mode -> identity.
    return jnp.dot(h.astype(w2.dtype), w2, preferred_element_type=jnp.float32)


def ffn_kernel_resident(x_ref, w1_ref, b1_ref, w2_ref, b2_ref, o_ref):
    """Weights fully resident in VMEM: single grid axis over row tiles,
    direct output write (no accumulator)."""
    y = _ffn_block(x_ref[...], w1_ref[...], b1_ref[...], w2_ref[...])
    o_ref[...] = (y + b2_ref[...].astype(jnp.float32)).astype(o_ref.dtype)


def ffn_kernel_split(x_ref, w1_ref, b1_ref, w2_ref, b2_ref, o_ref, acc_ref):
    """d_ff tiled as a reduction axis: accumulate partial 2nd-GEMM results."""
    k = pl.program_id(1)

    @pl.when(k == 0)
    def _():
        acc_ref[...] = jnp.zeros_like(acc_ref)

    acc_ref[...] += _ffn_block(x_ref[...], w1_ref[...], b1_ref[...], w2_ref[...])

    @pl.when(k == pl.num_programs(1) - 1)
    def _():
        o_ref[...] = (acc_ref[...]
                      + b2_ref[...].astype(jnp.float32)).astype(o_ref.dtype)


def positionwise_feed_forward(x, w1, b1, w2, b2):
    """x: (..., d_model) -> (..., d_model).

    Weights are stored as (in_features, out_features), i.e. the transpose of
    torch.nn.Linear.weight, so the kernel computes x @ W + b.
    """
    *lead, D = x.shape
    d_ff = w1.shape[1]
    N = 1
    for s in lead:
        N *= int(s)

    itm = jnp.dtype(x.dtype).itemsize
    itw = jnp.dtype(w1.dtype).itemsize
    sublane = max(8, 32 // max(itm, 1))      # 8 f32 / 16 bf16 / 32 int8
    budget = _vmem_budget_bytes()

    # ---- d_ff tiling: residency first, budget-driven otherwise. ------------
    w_bytes = (2 * D * d_ff + d_ff + D) * itw
    # Conservative residency check: assume double-buffered weight blocks even
    # though the stationary case requests pl.Buffered(1).
    resident = (2 * w_bytes
                + _row_tile_bytes(sublane, D, d_ff, itm, itw, False)) <= budget

    if resident:
        tf = d_ff
        avail = budget - 2 * w_bytes
        tm = (512 // sublane) * sublane
        while tm > sublane and _row_tile_bytes(tm, D, tf, itm, itw, False) > avail:
            tm -= sublane
        tm = max(tm, sublane)
    else:
        # Large row tile so the per-row-tile weight re-stream is amortized.
        tm = ((1024 if itm <= 2 else 512) // sublane) * sublane

        def fits(tf_, tm_):
            slab = 2 * (2 * D * tf_ + tf_) * itw + 2 * D * itw
            return slab + _row_tile_bytes(tm_, D, tf_, itm, itw, True) <= budget

        tf = None
        while tf is None:
            t = (d_ff // 128) * 128
            while t >= 128:
                if d_ff % t == 0 and fits(t, tm):
                    tf = t
                    break
                t -= 128
            if tf is None:
                if tm > sublane:
                    tm = max(sublane, (tm // 2 // sublane) * sublane)
                else:
                    tf = 128 if d_ff % 128 == 0 else d_ff   # last resort

    # ---- row tiling: sublane-aligned, prefer a divisor of the row count ----
    Np0 = _round_up(max(N, 1), sublane)
    tm = max(sublane, min(tm, Np0))
    tm = (tm // sublane) * sublane

    tm_div = None
    t = tm
    while t >= sublane:
        if Np0 % t == 0:
            tm_div = t
            break
        t -= sublane
    if tm_div is not None and 2 * tm_div >= tm:
        tm, Np = tm_div, Np0                 # no extra padding
    else:
        Np = _round_up(Np0, tm)              # fall back to padding

    # Keep >= 2 row tiles when rows allow it (both v7x TensorCores get work).
    if Np // tm == 1 and Np >= 2 * sublane and (Np // 2) % sublane == 0:
        tm = Np // 2

    num_i = Np // tm
    num_k = d_ff // tf

    x2d = x.reshape(N, D)
    if Np != N:
        x2d = jnp.pad(x2d, ((0, Np - N), (0, 0)))
    b1_2d = b1.reshape(1, d_ff)
    b2_2d = b2.reshape(1, D)

    # Weights are re-streamed once per row tile only when the k axis exists.
    weight_passes = 1 if num_k == 1 else num_i
    cost = pl.CostEstimate(
        flops=int(4 * Np * D * d_ff),
        transcendentals=0,
        bytes_accessed=int(2 * Np * D * itm
                           + weight_passes * (2 * D * d_ff + d_ff) * itw
                           + D * itw),
    )
    out_shape = jax.ShapeDtypeStruct((Np, D), x.dtype)

    def run(single_buffer_weights):
        def wspec(shape, index_map):
            if single_buffer_weights:
                return pl.BlockSpec(shape, index_map,
                                    pipeline_mode=pl.Buffered(1))
            return pl.BlockSpec(shape, index_map)

        if num_k == 1:
            kernel = ffn_kernel_resident
            grid = (num_i,)
            in_specs = [
                pl.BlockSpec((tm, D), lambda i: (i, 0)),     # x rows
                wspec((D, d_ff), lambda i: (0, 0)),          # W1 (stationary)
                wspec((1, d_ff), lambda i: (0, 0)),          # b1
                wspec((d_ff, D), lambda i: (0, 0)),          # W2 (stationary)
                wspec((1, D), lambda i: (0, 0)),             # b2
            ]
            out_specs = pl.BlockSpec((tm, D), lambda i: (i, 0))
            scratch = []
            dims = ("parallel",)
        else:
            kernel = ffn_kernel_split
            grid = (num_i, num_k)
            in_specs = [
                pl.BlockSpec((tm, D), lambda i, k: (i, 0)),  # x rows
                pl.BlockSpec((D, tf), lambda i, k: (0, k)),  # W1 column slab
                pl.BlockSpec((1, tf), lambda i, k: (0, k)),  # b1 slab
                pl.BlockSpec((tf, D), lambda i, k: (k, 0)),  # W2 row slab
                pl.BlockSpec((1, D), lambda i, k: (0, 0)),   # b2
            ]
            out_specs = pl.BlockSpec((tm, D), lambda i, k: (i, 0))
            scratch = [pltpu.VMEM((tm, D), jnp.float32)]
            dims = ("parallel", "arbitrary")

        return pl.pallas_call(
            kernel,
            out_shape=out_shape,
            grid_spec=pltpu.PrefetchScalarGridSpec(
                num_scalar_prefetch=0,
                grid=grid,
                in_specs=in_specs,
                out_specs=out_specs,
                scratch_shapes=scratch,
            ),
            compiler_params=pltpu.CompilerParams(
                dimension_semantics=dims,
                vmem_limit_bytes=int(budget)),
            cost_estimate=cost,
        )(x2d, w1, b1_2d, w2, b2_2d)

    if num_k == 1:
        try:
            out2d = run(True)     # stationary weights, single-buffered
        except Exception:
            out2d = run(False)    # fallback if pl.Buffered(1) is unsupported
    else:
        out2d = run(False)

    return out2d[:N].reshape(*lead, D)


if __name__ == "__main__":
    # Small but lane-dense shapes (d_model multiple of 128).
    batch, seq, d_model, d_ff = 2, 8, 128, 256

    key = jax.random.PRNGKey(0)
    kx, kw1, kb1, kw2, kb2 = jax.random.split(key, 5)

    x = jax.random.normal(kx, (batch, seq, d_model), dtype=jnp.float32)
    # "Linear" params stored as (in, out), i.e. W.T of the torch layout.
    w1 = jax.random.normal(kw1, (d_model, d_ff), dtype=jnp.float32) * 0.05
    b1 = jax.random.normal(kb1, (d_ff,), dtype=jnp.float32) * 0.05
    w2 = jax.random.normal(kw2, (d_ff, d_model), dtype=jnp.float32) * 0.05
    b2 = jax.random.normal(kb2, (d_model,), dtype=jnp.float32) * 0.05

    out = positionwise_feed_forward(x, w1, b1, w2, b2)
    out = jax.block_until_ready(out)

    # Pure-JAX reference (eval-mode dropout == identity).
    ref = jnp.maximum(x.reshape(-1, d_model) @ w1 + b1, 0.0) @ w2 + b2
    ref = ref.reshape(batch, seq, d_model)

    assert out.shape == (batch, seq, d_model)
    assert jnp.allclose(out, ref, atol=1e-4, rtol=1e-4), (
        float(jnp.max(jnp.abs(out - ref))))

    print("KERNEL_OK")
</pallas_src>

<mosaic_0001>
module attributes {stable_mosaic.version = 11 : i64} {
  func.func @ffn_kernel_resident(%arg0: i32, %arg1: memref<8x128xf32, #tpu.memory_space<vmem>>, %arg2: memref<128x256xf32, #tpu.memory_space<vmem>>, %arg3: memref<1x256xf32, #tpu.memory_space<vmem>>, %arg4: memref<256x128xf32, #tpu.memory_space<vmem>>, %arg5: memref<1x128xf32, #tpu.memory_space<vmem>>, %arg6: memref<8x128xf32, #tpu.memory_space<vmem>>) attributes {dimension_semantics = [#tpu.dimension_semantics<parallel>], iteration_bounds = array<i64: 2>, scalar_prefetch = 0 : i64, scratch_operands = 0 : i64, tpu.core_type = #tpu.core_type<tc>, window_params = [{transform_indices = @transform_0, window_bounds = array<i64: 8, 128>}, {pipeline_mode = #tpu.pipeline_mode<synchronous>, transform_indices = @transform_1, window_bounds = array<i64: 128, 256>}, {pipeline_mode = #tpu.pipeline_mode<synchronous>, transform_indices = @transform_2, window_bounds = array<i64: 1, 256>}, {pipeline_mode = #tpu.pipeline_mode<synchronous>, transform_indices = @transform_3, window_bounds = array<i64: 256, 128>}, {pipeline_mode = #tpu.pipeline_mode<synchronous>, transform_indices = @transform_4, window_bounds = array<i64: 1, 128>}, {transform_indices = @transform_5, window_bounds = array<i64: 8, 128>}]} {
    %c0 = arith.constant 0 : index
    %c0_0 = arith.constant 0 : index
    %0 = vector.load %arg1[%c0, %c0_0] : memref<8x128xf32, #tpu.memory_space<vmem>>, vector<8x128xf32>
    %c0_1 = arith.constant 0 : index
    %c0_2 = arith.constant 0 : index
    %1 = vector.load %arg2[%c0_1, %c0_2] : memref<128x256xf32, #tpu.memory_space<vmem>>, vector<128x256xf32>
    %c0_3 = arith.constant 0 : index
    %c0_4 = arith.constant 0 : index
    %2 = vector.load %arg3[%c0_3, %c0_4] : memref<1x256xf32, #tpu.memory_space<vmem>>, vector<1x256xf32>
    %c0_5 = arith.constant 0 : index
    %c0_6 = arith.constant 0 : index
    %3 = vector.load %arg4[%c0_5, %c0_6] : memref<256x128xf32, #tpu.memory_space<vmem>>, vector<256x128xf32>
    %cst = arith.constant dense<0.000000e+00> : vector<8x256xf32>
    %4 = tpu.matmul %0, %1, %cst {dimension_numbers = #tpu.dot_dimension_numbers<[1], [0], [0], [1], [0, 0, 1, 1], [], []>} : vector<8x128xf32>, vector<128x256xf32>, vector<8x256xf32> -> vector<8x256xf32>
    %5 = vector.broadcast %2 : vector<1x256xf32> to vector<8x256xf32>
    %6 = arith.addf %4, %5 : vector<8x256xf32>
    %cst_7 = arith.constant 0.000000e+00 : f32
    %7 = vector.broadcast %cst_7 : f32 to vector<8x256xf32>
    %8 = arith.maximumf %6, %7 : vector<8x256xf32>
    %cst_8 = arith.constant dense<0.000000e+00> : vector<8x128xf32>
    %9 = tpu.matmul %8, %3, %cst_8 {dimension_numbers = #tpu.dot_dimension_numbers<[1], [0], [0], [1], [0, 0, 1, 1], [], []>} : vector<8x256xf32>, vector<256x128xf32>, vector<8x128xf32> -> vector<8x128xf32>
    %c0_9 = arith.constant 0 : index
    %c0_10 = arith.constant 0 : index
    %10 = vector.load %arg5[%c0_9, %c0_10] : memref<1x128xf32, #tpu.memory_space<vmem>>, vector<1x128xf32>
    %11 = vector.broadcast %10 : vector<1x128xf32> to vector<8x128xf32>
    %12 = arith.addf %9, %11 : vector<8x128xf32>
    %c0_11 = arith.constant 0 : index
    %c0_12 = arith.constant 0 : index
    %13 = vector.load %arg6[%c0_11, %c0_12] : memref<8x128xf32, #tpu.memory_space<vmem>>, vector<8x128xf32>
    tpu.vector_store %arg6[%c0_11, %c0_12], %12 {strides = array<i32>} : memref<8x128xf32, #tpu.memory_space<vmem>>, vector<8x128xf32>,
    return
  }
  func.func @transform_0(%arg0: i32) -> (i32, i32) {
    %c0_i32 = arith.constant 0 : i32
    %c0_i32_0 = arith.constant 0 : i32
    return %arg0, %c0_i32 : i32, i32
  }
  func.func @transform_1(%arg0: i32) -> (i32, i32) {
    %c0_i32 = arith.constant 0 : i32
    %c0_i32_0 = arith.constant 0 : i32
    %c0_i32_1 = arith.constant 0 : i32
    return %c0_i32, %c0_i32_0 : i32, i32
  }
  func.func @transform_2(%arg0: i32) -> (i32, i32) {
    %c0_i32 = arith.constant 0 : i32
    %c0_i32_0 = arith.constant 0 : i32
    %c0_i32_1 = arith.constant 0 : i32
    return %c0_i32, %c0_i32_0 : i32, i32
  }
  func.func @transform_3(%arg0: i32) -> (i32, i32) {
    %c0_i32 = arith.constant 0 : i32
    %c0_i32_0 = arith.constant 0 : i32
    %c0_i32_1 = arith.constant 0 : i32
    return %c0_i32, %c0_i32_0 : i32, i32
  }
  func.func @transform_4(%arg0: i32) -> (i32, i32) {
    %c0_i32 = arith.constant 0 : i32
    %c0_i32_0 = arith.constant 0 : i32
    %c0_i32_1 = arith.constant 0 : i32
    return %c0_i32, %c0_i32_0 : i32, i32
  }
  func.func @transform_5(%arg0: i32) -> (i32, i32) {
    %c0_i32 = arith.constant 0 : i32
    %c0_i32_0 = arith.constant 0 : i32
    return %arg0, %c0_i32 : i32, i32
  }
}

module attributes {stable_mosaic.version = 11 : i64} {
  func.func @ffn_kernel_resident(%arg0: i32, %arg1: memref<8x128xf32, #tpu.memory_space<vmem>>, %arg2: memref<128x256xf32, #tpu.memory_space<vmem>>, %arg3: memref<1x256xf32, #tpu.memory_space<vmem>>, %arg4: memref<256x128xf32, #tpu.memory_space<vmem>>, %arg5: memref<1x128xf32, #tpu.memory_space<vmem>>, %arg6: memref<8x128xf32, #tpu.memory_space<vmem>>) attributes {dimension_semantics = [#tpu.dimension_semantics<parallel>], iteration_bounds = array<i64: 2>, scalar_prefetch = 0 : i64, scratch_operands = 0 : i64, tpu.core_type = #tpu.core_type<tc>, window_params = [{transform_indices = @transform_0, window_bounds = array<i64: 8, 128>}, {pipeline_mode = #tpu.pipeline_mode<synchronous>, transform_indices = @transform_1, window_bounds = array<i64: 128, 256>}, {pipeline_mode = #tpu.pipeline_mode<synchronous>, transform_indices = @transform_2, window_bounds = array<i64: 1, 256>}, {pipeline_mode = #tpu.pipeline_mode<synchronous>, transform_indices = @transform_3, window_bounds = array<i64: 256, 128>}, {pipeline_mode = #tpu.pipeline_mode<synchronous>, transform_indices = @transform_4, window_bounds = array<i64: 1, 128>}, {transform_indices = @transform_5, window_bounds = array<i64: 8, 128>}]} {
    %c0 = arith.constant 0 : index
    %c0_0 = arith.constant 0 : index
    %0 = vector.load %arg1[%c0, %c0_0] : memref<8x128xf32, #tpu.memory_space<vmem>>, vector<8x128xf32>
    %c0_1 = arith.constant 0 : index
    %c0_2 = arith.constant 0 : index
    %1 = vector.load %arg2[%c0_1, %c0_2] : memref<128x256xf32, #tpu.memory_space<vmem>>, vector<128x256xf32>
    %c0_3 = arith.constant 0 : index
    %c0_4 = arith.constant 0 : index
    %2 = vector.load %arg3[%c0_3, %c0_4] : memref<1x256xf32, #tpu.memory_space<vmem>>, vector<1x256xf32>
    %c0_5 = arith.constant 0 : index
    %c0_6 = arith.constant 0 : index
    %3 = vector.load %arg4[%c0_5, %c0_6] : memref<256x128xf32, #tpu.memory_space<vmem>>, vector<256x128xf32>
    %cst = arith.constant dense<0.000000e+00> : vector<8x256xf32>
    %4 = tpu.matmul %0, %1, %cst {dimension_numbers = #tpu.dot_dimension_numbers<[1], [0], [0], [1], [0, 0, 1, 1], [], []>} : vector<8x128xf32>, vector<128x256xf32>, vector<8x256xf32> -> vector<8x256xf32>
    %5 = vector.broadcast %2 : vector<1x256xf32> to vector<8x256xf32>
    %6 = arith.addf %4, %5 : vector<8x256xf32>
    %cst_7 = arith.constant 0.000000e+00 : f32
    %7 = vector.broadcast %cst_7 : f32 to vector<8x256xf32>
    %8 = arith.maximumf %6, %7 : vector<8x256xf32>
    %cst_8 = arith.constant dense<0.000000e+00> : vector<8x128xf32>
    %9 = tpu.matmul %8, %3, %cst_8 {dimension_numbers = #tpu.dot_dimension_numbers<[1], [0], [0], [1], [0, 0, 1, 1], [], []>} : vector<8x256xf32>, vector<256x128xf32>, vector<8x128xf32> -> vector<8x128xf32>
    %c0_9 = arith.constant 0 : index
    %c0_10 = arith.constant 0 : index
    %10 = vector.load %arg5[%c0_9, %c0_10] : memref<1x128xf32, #tpu.memory_space<vmem>>, vector<1x128xf32>
    %11 = vector.broadcast %10 : vector<1x128xf32> to vector<8x128xf32>
    %12 = arith.addf %9, %11 : vector<8x128xf32>
    %c0_11 = arith.constant 0 : index
    %c0_12 = arith.constant 0 : index
    %13 = vector.load %arg6[%c0_11, %c0_12] : memref<8x128xf32, #tpu.memory_space<vmem>>, vector<8x128xf32>
    tpu.vector_store %arg6[%c0_11, %c0_12], %12 {strides = array<i32>} : memref<8x128xf32, #tpu.memory_space<vmem>>, vector<8x128xf32>,
    return
  }
  func.func @transform_0(%arg0: i32) -> (i32, i32) {
    %c0_i32 = arith.constant 0 : i32
    %c0_i32_0 = arith.constant 0 : i32
    return %arg0, %c0_i32 : i32, i32
  }
  func.func @transform_1(%arg0: i32) -> (i32, i32) {
    %c0_i32 = arith.constant 0 : i32
    %c0_i32_0 = arith.constant 0 : i32
    %c0_i32_1 = arith.constant 0 : i32
    return %c0_i32, %c0_i32_0 : i32, i32
  }
  func.func @transform_2(%arg0: i32) -> (i32, i32) {
    %c0_i32 = arith.constant 0 : i32
    %c0_i32_0 = arith.constant 0 : i32
    %c0_i32_1 = arith.constant 0 : i32
    return %c0_i32, %c0_i32_0 : i32, i32
  }
  func.func @transform_3(%arg0: i32) -> (i32, i32) {
    %c0_i32 = arith.constant 0 : i32
    %c0_i32_0 = arith.constant 0 : i32
    %c0_i32_1 = arith.constant 0 : i32
    return %c0_i32, %c0_i32_0 : i32, i32
  }
  func.func @transform_4(%arg0: i32) -> (i32, i32) {
    %c0_i32 = arith.constant 0 : i32
    %c0_i32_0 = arith.constant 0 : i32
    %c0_i32_1 = arith.constant 0 : i32
    return %c0_i32, %c0_i32_0 : i32, i32
  }
  func.func @transform_5(%arg0: i32) -> (i32, i32) {
    %c0_i32 = arith.constant 0 : i32
    %c0_i32_0 = arith.constant 0 : i32
    return %arg0, %c0_i32 : i32, i32
  }
}

</mosaic_0001>

<bundles_post_ra>
// kernel: tpu_custom_call.1
= control target key start
LH: loop header
LB: loop body
LE: loop exit
PB: predicated region body
PF: predicated region fallthrough
CT: control target
= control target key end

     0   :  { %10 = vsyncpa [#allocation3], 0  ;;  %s1091_s0 = inlined_call_operand.hbm [shape: f32[16,128], index: 0, kind: input, shape index: {}]   ;;  %s1092_s1 = inlined_call_operand.hbm [shape: f32[128,256], index: 1, kind: input, shape index: {}]   ;;  %s1093_s2 = inlined_call_operand.vmem [shape: f32[1,256], index: 2, kind: input, shape index: {}]   ;;  %s1094_s3 = inlined_call_operand.hbm [shape: f32[256,128], index: 3, kind: input, shape index: {}]   ;;  %s1095_s4 = inlined_call_operand.vmem [shape: f32[1,128], index: 4, kind: input, shape index: {}]   ;;  %s1096_s5 = inlined_call_operand.hbm [shape: f32[16,128], index: 5, kind: output, shape index: {}]  }
   0x1   :  { %12 = vsyncpa [#allocation3 + $0x1], 0 }
   0x2   :  { %13 = vsyncpa [#allocation6], 0 }
   0x3   :  { %14 = vsyncpa [#allocation4], 0 }
   0x4   :  { %16 = vsyncpa [#allocation4 + $0x1], 0  ;;  %s913_s18 = smov 0   ;;  %s915_s19 = smov 0  }
   0x5   :  { %s917_s20 = smov 0   ;;  %s919_s21 = smov 0  }
   0x6 LB: > { %s934_s22 = sadd.s32 4294967295, %s872_s21   ;;  %s600_s23 = sadd.s32 4294967294, %s872_s21   ;;  %s872_s21 = sphi %s919_s21, %s1118_s21   ;;  %s868_s20 = sphi %s917_s20, %s1117_s20   ;;  %s864_s19 = sphi %s915_s19, %s1116_s19   ;;  %s860_s18 = sphi %s913_s18, %s1115_s18  }
   0x7   : > { %p42_p0 = scmp.ne.s32.totalorder %s864_s19, %s860_s18  ;;  %p1097_p1 = scmp.eq.s32.totalorder %s934_s22, 0 }
   0x8   : > { %p156_p3 = scmp.eq.s32.totalorder %s600_s23, 1  ;;  %p601_p5 = scmp.ge.s32.totalorder %s872_s21, 1 }
   0x9   : > { %p943_p4 = por %p1097_p1, %p42_p0  ;;  %p163_p7 = scmp.lt.s32.totalorder %s872_s21, 3 }
   0xa   : > { %p948_p6 = por %p156_p3, %p42_p0  ;;  %s874_s27 = smov [#allocation5]  }
   0xb   : > { %s1101_s24 = scalar_select %p943_p4, 1, 0 }
   0xc   : > { %s1102_s25 = scalar_select %p948_p6, 1, 0 }
   0xd   : > { %p953_p8 = pnand %p601_p5, %p163_p7  ;;  %s175_s28 = sshll.u32 %s874_s27, 4  ;;  %s176_s28 = int_to_ptr.vmem [resolvable:$true] %s175_s28 }
   0xe   : > { %s875_s30 = smov [#allocation7]   ;;  %s735_s7 = scalar_lea.vmem %s176_s28, 4096 }
   0xf   : > { %s1103_s26 = scalar_select %p953_p8, 1, 0 }
  0x10   : > { %p664_p9 = pneg %p953_p8  ;;  %s191_s6 = sshll.u32 %s875_s30, 4  ;;  %s192_s6 = int_to_ptr.vmem [resolvable:$true] %s191_s6 }
  0x11   : > { %p736_p13 = scmp.ne.s32.totalorder %s176_s28, %s735_s7  ;;  %p743_p5 = scmp.lt.s32.totalorder %s176_s28, %s176_s28 }
  0x12   : > { %p962_p11 = pnand %p664_p9, %p1097_p1  ;;  %p744_p7 = scmp.lt.s32.totalorder %s735_s7, %s735_s7 }
  0x14   : > { %p726_p12 = pneg %p962_p11  ;;  %p745_p10 = por %p744_p7, %p743_p5 }
  0x16   : > { %p738_p0 = pnand %p736_p13, %p726_p12 }
  0x18   : > { %p739_p3 = pneg %p738_p0 }
  0x1a   : > { %p746_p9 = pnand %p745_p10, %p739_p3 }
  0x1c   : > { %749 = shalt.err (!%p746_p9)
}
  0x1d   : > { %s876_s8 = smov 256   ;;  %s877_s9 = smov 16  }
  0x1e   : > { %667 = dma.hbm_to_vmem [thread:$0]  (!%p962_p11), %s1092_s1, 4096, %s176_s28, [#allocation6], %s876_s8, %s876_s8, %s877_s9  }
  0x1f   : > { %s761_s12 = scalar_lea.vmem %s192_s6, 4096  ;;  %p769_p2 = scmp.lt.s32.totalorder %s192_s6, %s192_s6 }
  0x20   : > { %p762_p1 = scmp.ne.s32.totalorder %s192_s6, %s761_s12  ;;  %p770_p6 = scmp.lt.s32.totalorder %s761_s12, %s761_s12 }
  0x22   : > { %p764_p13 = pnand %p762_p1, %p726_p12  ;;  %p771_p5 = por %p770_p6, %p769_p2 }
  0x24   : > { %p765_p0 = pneg %p764_p13 }
  0x26   : > { %p772_p10 = pnand %p771_p5, %p765_p0 }
  0x28   : > { %775 = shalt.err (!%p772_p10)
}
  0x29   : > { %s878_s13 = smov 128   ;;  %s879_s14 = smov 8  }
  0x2a   : > { %670 = dma.hbm_to_vmem [thread:$0]  (!%p962_p11), %s1094_s3, 4096, %s192_s6, [#allocation6], %s878_s13, %s878_s13, %s879_s14  }
  0x2b   : > { %s985_s17 = sadd.s32 1, %s872_s21   ;;  %s29_s27 = sadd.s32 1, %s868_s20 }
  0x2c   : > { %s26_s23 = ssub.s32 %s872_s21, %s985_s17  ;;  %p36_p2 = scmp.ne.s32.totalorder %s868_s20, %s864_s19 }
  0x2d   : > { %p27_p1 = scmp.eq.s32.totalorder %s26_s23, 0  ;;  %p37_p6 = scmp.eq.s32.totalorder %s872_s21, 0 }
  0x2e   : > { %p1105_p3 = scmp.eq.s32.totalorder %s934_s22, 1  ;;  %p681_p9 = scmp.lt.s32.totalorder %s872_s21, 2 }
  0x2f   : > { %s994_s28 = scalar_select %p27_p1, %s868_s20, %s29_s27  }
  0x30   : > { %p38_p12 = por %p37_p6, %p36_p2  ;;  %p998_p7 = por %p1105_p3, %p36_p2 }
  0x31   : > { %s208_s29 = sand.u32 1, %s868_s20   ;;  %s606_s6 = sshll.u32 %s872_s21, 7 }
  0x32   : > { %s1106_s30 = scalar_select %p998_p7, 1, 0 }
  0x33   : > { %s605_s7 = sshll.u32 %s208_s29, 3  ;;  %s1008_s10 = scalar_lea.hbm %s1091_s0, %s606_s6 }
  0x34   : > { %s212_s11 = scalar_lea.vmem [#allocation2], %s605_s7  ;;  %p1010_p11 = pnand %p681_p9, %p38_p12 }
  0x35   : > { %s219_s12 = sshll.u32 %s212_s11, 4  ;;  %s209_s14 = scalar_lea.sflag [#allocation3], %s208_s29  ;;  %s220_s12 = int_to_ptr.vmem [resolvable:$true] %s219_s12 }
  0x36   : > { %s776_s15 = scalar_lea.hbm %s1008_s10, 128  ;;  %p778_p0 = pneg %p1010_p11 }
  0x37   : > { %p777_p13 = scmp.ne.s32.totalorder %s1008_s10, %s776_s15  ;;  %s781_s27 = scalar_lea.hbm %s1091_s0, 256 }
  0x38   : > { %p782_p1 = scmp.lt.s32.totalorder %s1008_s10, %s1091_s0  ;;  %p783_p2 = scmp.lt.s32.totalorder %s781_s27, %s776_s15 }
  0x39   : > { %p779_p5 = pnand %p778_p0, %p777_p13 }
  0x3a   : > { %p784_p6 = por %p783_p2, %p782_p1 }
  0x3b   : > { %p780_p10 = pneg %p779_p5 }
  0x3d   : > { %p785_p12 = pnand %p784_p6, %p780_p10 }
  0x3f   : > { %788 = shalt.err (!%p785_p12)
}
  0x40   : > { %s789_s8 = scalar_lea.vmem %s220_s12, 128  ;;  %s880_s29 = smov [#allocation2]  }
  0x41   : > { %p790_p3 = scmp.ne.s32.totalorder %s220_s12, %s789_s8  ;;  %s794_s9 = sshll.u32 %s880_s29, 4  ;;  %s795_s9 = int_to_ptr.vmem [resolvable:$false] %s794_s9 }
  0x42   : > { %s796_s11 = scalar_lea.vmem %s795_s9, 256  ;;  %p797_p13 = scmp.lt.s32.totalorder %s220_s12, %s795_s9 }
  0x43   : > { %p792_p9 = pnand %p790_p3, %p778_p0  ;;  %p798_p5 = scmp.lt.s32.totalorder %s796_s11, %s789_s8 }
  0x45   : > { %p793_p7 = pneg %p792_p9  ;;  %p799_p4 = por %p798_p5, %p797_p13 }
  0x47   : > { %p800_p8 = pnand %p799_p4, %p793_p7 }
  0x49   : > { %803 = shalt.err (!%p800_p8)
}
  0x4a   : > { %674 = dma.hbm_to_vmem [thread:$0]  (!%p1010_p11), %s1008_s10, 128, %s220_s12, %s209_s14  }
  0x4b   : > { %p1108_p10 = scmp.ne.s32.totalorder %s1103_s26, 0 }
  0x4c   : > { %s1031_s15 = sand.u32 (!%p1108_p10), 1, %s864_s19   ;;  %p1109_p4 = scmp.ne.s32.totalorder (!%p1108_p10), %s1101_s24, 0 }
  0x4d   : > { %228 = sbr.rel (%p1108_p10) target bundleno = 531 (0x213), region = 40  ;;  %s608_s16 = sshll.u32 (!%p1108_p10), %s1031_s15, 3 }
  0x4e   : > { %s231_s23 = scalar_lea.sflag (!%p1108_p10), [#allocation3], %s1031_s15  ;;  %s1037_s27 = scalar_lea.vmem (!%p1108_p10), [#allocation2], %s608_s16 }
  0x52   : > { %847 = dma.done.wait (%p1109_p4), %s231_s23, 128  }
  0x53   : > { %849 = vsyncadd (%p1109_p4), %s231_s23, 4294967168  ;;  %p1110_p8 = scmp.eq.s32.totalorder %s934_s22, 0 }
  0x55   : > { %851 = dma.done.wait (%p1110_p8), [#allocation6], 8192   ;;  %p1111_p7 = pmov %p1110_p8 }
  0x56   : > { %v881_v0 = vmov 0.0   ;;  %v301_v1 = vld [vmem:[#allocation5 + $0xf8] sm:$0xff]  ;;  %v300_v2 = vld [vmem:[#allocation5 + $0xf0] sm:$0xff]  ;;  %v299_v3 = vld [vmem:[#allocation5 + $0xe8] sm:$0xff]  ;;  %s614_s13 = sshll.u32 %s934_s22, 7  ;;  %s268_s14 = scalar_lea.vmem [#allocation8], %s608_s16 }
  0x57   : > { %853 = vsyncadd (%p1111_p7), [#allocation6], 4294959104  ;;  %410 = vmatprep.mubr.f32.mxu0 %v881_v0  ;;  %346 = vmatprep.subr.mxu0 %v301_v1  ;;  %v298_v4 = vld [vmem:[#allocation5 + $0xe0] sm:$0xff]  ;;  %v297_v5 = vld [vmem:[#allocation5 + $0xd8] sm:$0xff]  ;;  %s511_s6 = sshll.u32 %s268_s14, 4  ;;  %s509_s29 = scalar_lea.hbm %s1096_s5, %s614_s13  ;;  %s512_s6 = int_to_ptr.vmem [resolvable:$true] %s511_s6 }
  0x58   : > { %347 = vmatpush1.msra.mxu0 %v300_v2  ;;  %v296_v6 = vld [vmem:[#allocation5 + $0xd0] sm:$0xff]  ;;  %v295_v7 = vld [vmem:[#allocation5 + $0xc8] sm:$0xff]  ;;  %v294_v8 = vld [vmem:[#allocation5 + $0xc0] sm:$0xff]  ;;  %v336_v2 = vlaneseq  ;;  %s498_s9 = scalar_lea.sflag [#allocation4], %s1031_s15  ;;  %s804_s11 = scalar_lea.vmem %s512_s6, 128 }
  0x59   : > { %348 = vmatprep.subr.mxu0 %v299_v3  ;;  %v293_v9 = vld [vmem:[#allocation5 + $0xb8] sm:$0xff]  ;;  %v292_v10 = vld [vmem:[#allocation5 + $0xb0] sm:$0xff]  ;;  %v291_v11 = vld [vmem:[#allocation5 + $0xa8] sm:$0xff]  ;;  %p805_p11 = scmp.ne.s32.totalorder %s512_s6, %s804_s11  ;;  %p1112_p0 = scmp.ne.s32.totalorder %s1106_s30, 0 }
  0x5a   : > { %349 = vmatpush1.msra.mxu0 %v298_v4  ;;  %v290_v12 = vld [vmem:[#allocation5 + $0xa0] sm:$0xff]  ;;  %v289_v13 = vld [vmem:[#allocation5 + $0x98] sm:$0xff]  ;;  %v288_v14 = vld [vmem:[#allocation5 + $0x90] sm:$0xff]  ;;  %v337_v3 = vshrl.u32 %v336_v2, 7  ;;  %s882_s23 = smov [#allocation8]  }
  0x5b   : > { %350 = vmatprep.subr.mxu0 %v297_v5  ;;  %v334_v15 = vld [vmem:[#allocation7 + $0xf8] sm:$0xff]  ;;  %v333_v17 = vld [vmem:[#allocation7 + $0xf0] sm:$0xff]  ;;  %v287_v18 = vld [vmem:[#allocation5 + $0x88] sm:$0xff]  ;;  %p806_p1 = pnand %p805_p11, %p1112_p0 }
  0x5c   : > { %351 = vmatpush1.msra.mxu0 %v296_v6  ;;  %v318_v16 = vld [vmem:[#allocation7 + $0x78] sm:$0xff]  ;;  %617 = vmatprep.subr.mxu1 %v334_v15  ;;  %v317_v19 = vld [vmem:[#allocation7 + $0x70] sm:$0xff]  ;;  %v286_v20 = vld [vmem:[#allocation5 + $0x80] sm:$0xff]  ;;  %v338_v4 = vsub.s32 0, %v337_v3  ;;  %v342_v6 = vsub.s32 1, %v337_v3 }
  0x5d   : > { %352 = vmatprep.subr.mxu0 %v295_v7  ;;  %618 = vmatpush3.msra.mxu1 %v318_v16  ;;  %v332_v21 = vld [vmem:[#allocation7 + $0xe8] sm:$0xff]  ;;  %v285_v22 = vld [vmem:[#allocation5 + $0x78] sm:$0xff]  ;;  %v284_v24 = vld [vmem:[#allocation5 + $0x70] sm:$0xff]  ;;  %p807_p2 = pneg %p806_p1 }
  0x5e   : > { %353 = vmatpush1.msra.mxu0 %v294_v8  ;;  %619 = vmatprep.subr.mxu1 %v333_v17  ;;  %v316_v23 = vld [vmem:[#allocation7 + $0x68] sm:$0xff]  ;;  %v331_v25 = vld [vmem:[#allocation7 + $0xe0] sm:$0xff]  ;;  %v330_v29 = vld [vmem:[#allocation7 + $0xd8] sm:$0xff] }
  0x5f   : > { %354 = vmatprep.subr.mxu0 %v293_v9  ;;  %620 = vmatpush3.msra.mxu1 %v317_v19  ;;  %v283_v26 = vld [vmem:[#allocation5 + $0x68] sm:$0xff]  ;;  %v315_v27 = vld [vmem:[#allocation7 + $0x60] sm:$0xff]  ;;  %v281_v30 = vld [vmem:[#allocation5 + $0x58] sm:$0xff] }
  0x60   : > { %355 = vmatpush1.msra.mxu0 %v292_v10  ;;  %621 = vmatprep.subr.mxu1 %v332_v21  ;;  %v282_v28 = vld [vmem:[#allocation5 + $0x60] sm:$0xff]  ;;  %v314_v31 = vld [vmem:[#allocation7 + $0x58] sm:$0xff]  ;;  %v280_v32 = vld [vmem:[#allocation5 + $0x50] sm:$0xff] }
  0x61   : > { %356 = vmatprep.subr.mxu0 %v291_v11  ;;  %622 = vmatpush3.msra.mxu1 %v316_v23  ;;  %v329_v33 = vld [vmem:[#allocation7 + $0xd0] sm:$0xff]  ;;  %v279_v34 = vld [vmem:[#allocation5 + $0x48] sm:$0xff]  ;;  %v278_v36 = vld [vmem:[#allocation5 + $0x40] sm:$0xff] }
  0x62   : > { %357 = vmatpush1.msra.mxu0 %v290_v12  ;;  %623 = vmatprep.subr.mxu1 %v331_v25  ;;  %v313_v35 = vld [vmem:[#allocation7 + $0x50] sm:$0xff]  ;;  %v328_v37 = vld [vmem:[#allocation7 + $0xc8] sm:$0xff]  ;;  %v277_v38 = vld [vmem:[#allocation5 + $0x38] sm:$0xff] }
  0x63   : > { %358 = vmatprep.subr.mxu0 %v289_v13  ;;  %624 = vmatpush3.msra.mxu1 %v315_v27  ;;  %v312_v39 = vld [vmem:[#allocation7 + $0x48] sm:$0xff]  ;;  %v276_v40 = vld [vmem:[#allocation5 + $0x30] sm:$0xff]  ;;  %v327_v41 = vld [vmem:[#allocation7 + $0xc0] sm:$0xff] }
  0x64   : > { %359 = vmatpush1.msra.mxu0 %v288_v14  ;;  %625 = vmatprep.subr.mxu1 %v330_v29  ;;  %v275_v42 = vld [vmem:[#allocation5 + $0x28] sm:$0xff]  ;;  %v311_v43 = vld [vmem:[#allocation7 + $0x40] sm:$0xff]  ;;  %v326_v45 = vld [vmem:[#allocation7 + $0xb8] sm:$0xff] }
  0x65   : > { %360 = vmatprep.subr.mxu0 %v287_v18  ;;  %626 = vmatpush3.msra.mxu1 %v314_v31  ;;  %v274_v44 = vld [vmem:[#allocation5 + $0x20] sm:$0xff]  ;;  %v273_v46 = vld [vmem:[#allocation5 + $0x18] sm:$0xff]  ;;  %v272_v48 = vld [vmem:[#allocation5 + $0x10] sm:$0xff] }
  0x66   : > { %361 = vmatpush1.msra.mxu0 %v286_v20  ;;  %627 = vmatprep.subr.mxu1 %v329_v33  ;;  %v310_v47 = vld [vmem:[#allocation7 + $0x38] sm:$0xff]  ;;  %v325_v49 = vld [vmem:[#allocation7 + $0xb0] sm:$0xff]  ;;  %v271_v50 = vld [vmem:[#allocation5 + $0x8] sm:$0xff] }
  0x67   : > { %362 = vmatprep.subr.mxu0 %v285_v22  ;;  %628 = vmatpush3.msra.mxu1 %v313_v35  ;;  %v309_v51 = vld [vmem:[#allocation7 + $0x30] sm:$0xff]  ;;  %v270_v52 = vld [vmem:[#allocation5] sm:$0xff]  ;;  %v324_v53 = vld [vmem:[#allocation7 + $0xa8] sm:$0xff] }
  0x68   : > { %363 = vmatpush1.msra.mxu0 %v284_v24  ;;  %629 = vmatprep.subr.mxu1 %v328_v37  ;;  %v269_v54 = vld [vmem:[%s1037_s27] sm:$0xff]  ;;  %v308_v55 = vld [vmem:[#allocation7 + $0x28] sm:$0xff]  ;;  %v323_v56 = vld [vmem:[#allocation7 + $0xa0] sm:$0xff]  ;;  %s808_s27 = sshll.u32 %s882_s23, 4  ;;  %s809_s27 = int_to_ptr.vmem [resolvable:$false] %s808_s27 }
  0x69   : > { %364 = vmatprep.subr.mxu0 %v283_v26  ;;  %630 = vmatpush3.msra.mxu1 %v312_v39  ;;  %v307_v57 = vld [vmem:[#allocation7 + $0x20] sm:$0xff]  ;;  %v322_v58 = vld [vmem:[#allocation7 + $0x98] sm:$0xff]  ;;  %v321_v60 = vld [vmem:[#allocation7 + $0x90] sm:$0xff]  ;;  %s810_s22 = scalar_lea.vmem %s809_s27, 256  ;;  %p811_p6 = scmp.lt.s32.totalorder %s512_s6, %s809_s27 }
  0x6a   : > { %365 = vmatpush1.msra.mxu0 %v282_v28  ;;  %631 = vmatprep.subr.mxu1 %v327_v41  ;;  %v306_v59 = vld [vmem:[#allocation7 + $0x18] sm:$0xff]  ;;  %v305_v61 = vld [vmem:[#allocation7 + $0x10] sm:$0xff]  ;;  %v320_v62 = vld [vmem:[#allocation7 + $0x88] sm:$0xff]  ;;  %p812_p12 = scmp.lt.s32.totalorder %s810_s22, %s804_s11 }
  0x6b   : > { %366 = vmatprep.subr.mxu0 %v281_v30  ;;  %632 = vmatpush3.msra.mxu1 %v311_v43  ;;  %v304_v63 = vld [vmem:[#allocation7 + $0x8] sm:$0xff]  ;;  %v319_v0 = vld [vmem:[#allocation7 + $0x80] sm:$0xff]  ;;  %v302_v5 = vld [vmem:[%s1093_s2] sm:$0x3] }
  0x6c   : > { %367 = vmatpush1.msra.mxu0 %v280_v32  ;;  %633 = vmatprep.subr.mxu1 %v326_v45  ;;  %v303_v1 = vld [vmem:[#allocation7] sm:$0xff]  ;;  %v339_v7 = vrot.slane %v302_v5, %v338_v4  ;;  %v343_v8 = vrot.slane %v302_v5, %v342_v6  ;;  %v612_v16 = vld [vmem:[%s1095_s4] ss:$0 sm:$0xff]  ;;  %p813_p3 = por %p812_p12, %p811_p6 }
  0x6d   : > { %368 = vmatprep.subr.mxu0 %v279_v34  ;;  %634 = vmatpush3.msra.mxu1 %v310_v47 }
  0x6e   : > { %369 = vmatpush1.msra.mxu0 %v278_v36  ;;  %635 = vmatprep.subr.mxu1 %v325_v49  ;;  %p814_p9 = pnand %p813_p3, %p807_p2 }
  0x6f   : > { %370 = vmatprep.subr.mxu0 %v277_v38  ;;  %636 = vmatpush3.msra.mxu1 %v309_v51 }
  0x70   : > { %371 = vmatpush1.msra.mxu0 %v276_v40  ;;  %637 = vmatprep.subr.mxu1 %v324_v53 }
  0x71   : > { %372 = vmatprep.subr.mxu0 %v275_v42  ;;  %638 = vmatpush3.msra.mxu1 %v308_v55 }
  0x72   : > { %373 = vmatpush1.msra.mxu0 %v274_v44  ;;  %639 = vmatprep.subr.mxu1 %v323_v56 }
  0x73   : > { %374 = vmatprep.subr.mxu0 %v273_v46  ;;  %640 = vmatpush3.msra.mxu1 %v307_v57 }
  0x74   : > { %375 = vmatpush1.msra.mxu0 %v272_v48  ;;  %641 = vmatprep.subr.mxu1 %v322_v58 }
  0x75   : > { %376 = vmatprep.subr.mxu0 %v271_v50  ;;  %642 = vmatpush3.msra.mxu1 %v306_v59 }
  0x76   : > { %377 = vmatpush1.msra.mxu0 %v270_v52  ;;  %643 = vmatprep.subr.mxu1 %v321_v60 }
  0x77   : > { %411 = vmatmul.mubr.f32.vlgmr.msra.gmra.mxu0 %v269_v54  ;;  %644 = vmatpush3.msra.mxu1 %v305_v61 }
  0x78   : > { %645 = vmatprep.subr.mxu1 %v320_v62 }
  0x79   : > { %646 = vmatpush3.msra.mxu1 %v304_v63 }
  0x7a   : > { %647 = vmatprep.subr.mxu1 %v319_v0 }
  0x7b   : > { %648 = vmatpush3.msra.mxu1 %v303_v1 }
 0x137   : > { %v412_v9 = vpop.f32.mrf.mxu0 }
 0x138   : > { %v413_v10 = vadd.f32 %v412_v9, %v339_v7 }
 0x139   : > { %v414_v11 = vpop.f32.mrf.mxu0 }
 0x13a   : > { %v415_v12 = vadd.f32 %v414_v11, %v343_v8  ;;  %v417_v14 = vmax.f32 %v413_v10, 0.0 }
 0x13c   : > { %v418_v13 = vmax.f32 %v415_v12, 0.0 }
 0x13e   : > { %490 = vmatprep.mubr.f32.mxu1 %v418_v13 }
 0x13f   : > { %491 = vmatmul.mubr.f32.vlgmr.msra.gmra.mxu1 %v417_v14 }
 0x1ff   : > { %v649_v15 = vpop.f32.mrf.mxu1 }
 0x201   : > { %v650_v17 = vpop.f32.mrf.mxu1 }
 0x202   : > { %v651_v18 = vadd.f32 %v650_v17, %v649_v15 }
 0x204   : > { %v493_v19 = vadd.f32 %v651_v18, %v612_v16 }
 0x206   : > { %496 = vst [vmem:[%s268_s14] sm:$0xff] %v493_v19 }
 0x207   : > { %817 = shalt.err (!%p814_p9)
}
 0x208   : > { %s818_s16 = scalar_lea.hbm %s509_s29, 128  ;;  %s822_s26 = scalar_lea.hbm %s1096_s5, 256 }
 0x209   : > { %p819_p13 = scmp.ne.s32.totalorder %s509_s29, %s818_s16  ;;  %p823_p4 = scmp.lt.s32.totalorder %s509_s29, %s1096_s5 }
 0x20a   : > { %p824_p8 = scmp.lt.s32.totalorder %s822_s26, %s818_s16 }
 0x20b   : > { %p820_p5 = pnand %p819_p13, %p1112_p0 }
 0x20c   : > { %p825_p7 = por %p824_p8, %p823_p4 }
 0x20d   : > { %p821_p10 = pneg %p820_p5 }
 0x20f   : > { %p826_p11 = pnand %p825_p7, %p821_p10 }
 0x211   : > { %829 = shalt.err (!%p826_p11)
}
 0x212   : > { %662 = dma.vmem_to_hbm [thread:$0]  (%p1112_p0), %s512_s6, 128, %s509_s29, %s498_s9  }
 0x213 PF: > { %s523_s13 = sand.u32 1, %s860_s18   ;;  %p1113_p1 = scmp.ne.s32.totalorder %s1102_s25, 0 }
 0x214   : > { %p1114_p2 = scmp.ge.s32.totalorder %s872_s21, 2  ;;  %s524_s14 = scalar_lea.sflag [#allocation4], %s523_s13 }
 0x216   : > { %p676_p6 = pnand %p1114_p2, %p1113_p1 }
 0x218   : > { %p677_p12 = pneg %p676_p6 }
 0x21a   : > { %855 = dma.done.wait (%p677_p12), %s524_s14, 128  }
 0x21b   : > { %857 = vsyncadd (%p677_p12), %s524_s14, 4294967168  ;;  %p19_p3 = scmp.ge.s32.totalorder %s985_s17, 4   ;;  %s1115_s18 = smov %s864_s19 }
 0x21c   : > { %s1116_s19 = smov %s868_s20  ;;  %s1117_s20 = smov %s994_s28 }
 0x21d   : > { %s1118_s21 = smov %s985_s17  ;;  %21 = sbr.rel (!%p19_p3) target bundleno = 6 (0x6), region = 93 }
 0x222   :  { %529 = vsyncpa [#allocation3], 1 }
 0x223   :  { %531 = vsyncpa [#allocation3 + $0x1], 1 }
 0x224   :  { %532 = vsyncpa [#allocation6], 1 }
 0x225   :  { %533 = vsyncpa [#allocation4], 1 }
 0x226   :  { %535 = vsyncpa [#allocation4 + $0x1], 1 }

// kernel: tpu_custom_call.1
= control target key start
LH: loop header
LB: loop body
LE: loop exit
PB: predicated region body
PF: predicated region fallthrough
CT: control target
= control target key end

     0   :  { %10 = vsyncpa [#allocation3], 0  ;;  %s1091_s0 = inlined_call_operand.hbm [shape: f32[16,128], index: 0, kind: input, shape index: {}]   ;;  %s1092_s1 = inlined_call_operand.hbm [shape: f32[128,256], index: 1, kind: input, shape index: {}]   ;;  %s1093_s2 = inlined_call_operand.vmem [shape: f32[1,256], index: 2, kind: input, shape index: {}]   ;;  %s1094_s3 = inlined_call_operand.hbm [shape: f32[256,128], index: 3, kind: input, shape index: {}]   ;;  %s1095_s4 = inlined_call_operand.vmem [shape: f32[1,128], index: 4, kind: input, shape index: {}]   ;;  %s1096_s5 = inlined_call_operand.hbm [shape: f32[16,128], index: 5, kind: output, shape index: {}]  }
   0x1   :  { %12 = vsyncpa [#allocation3 + $0x1], 0 }
   0x2   :  { %13 = vsyncpa [#allocation6], 0 }
   0x3   :  { %14 = vsyncpa [#allocation4], 0 }
   0x4   :  { %16 = vsyncpa [#allocation4 + $0x1], 0  ;;  %s913_s18 = smov 0   ;;  %s915_s19 = smov 0  }
   0x5   :  { %s917_s20 = smov 0   ;;  %s919_s21 = smov 0  }
   0x6 LB: > { %s934_s22 = sadd.s32 4294967295, %s872_s21   ;;  %s600_s23 = sadd.s32 4294967294, %s872_s21   ;;  %s872_s21 = sphi %s919_s21, %s1118_s21   ;;  %s868_s20 = sphi %s917_s20, %s1117_s20   ;;  %s864_s19 = sphi %s915_s19, %s1116_s19   ;;  %s860_s18 = sphi %s913_s18, %s1115_s18  }
   0x7   : > { %p42_p0 = scmp.ne.s32.totalorder %s864_s19, %s860_s18  ;;  %p1097_p1 = scmp.eq.s32.totalorder %s934_s22, 0 }
   0x8   : > { %p156_p3 = scmp.eq.s32.totalorder %s600_s23, 1  ;;  %p601_p5 = scmp.ge.s32.totalorder %s872_s21, 1 }
   0x9   : > { %p943_p4 = por %p1097_p1, %p42_p0  ;;  %p163_p7 = scmp.lt.s32.totalorder %s872_s21, 3 }
   0xa   : > { %p948_p6 = por %p156_p3, %p42_p0  ;;  %s874_s27 = smov [#allocation5]  }
   0xb   : > { %s1101_s24 = scalar_select %p943_p4, 1, 0 }
   0xc   : > { %s1102_s25 = scalar_select %p948_p6, 1, 0 }
   0xd   : > { %p953_p8 = pnand %p601_p5, %p163_p7  ;;  %s175_s28 = sshll.u32 %s874_s27, 4  ;;  %s176_s28 = int_to_ptr.vmem [resolvable:$true] %s175_s28 }
   0xe   : > { %s875_s30 = smov [#allocation7]   ;;  %s735_s7 = scalar_lea.vmem %s176_s28, 4096 }
   0xf   : > { %s1103_s26 = scalar_select %p953_p8, 1, 0 }
  0x10   : > { %p664_p9 = pneg %p953_p8  ;;  %s191_s6 = sshll.u32 %s875_s30, 4  ;;  %s192_s6 = int_to_ptr.vmem [resolvable:$true] %s191_s6 }
  0x11   : > { %p736_p13 = scmp.ne.s32.totalorder %s176_s28, %s735_s7  ;;  %p743_p5 = scmp.lt.s32.totalorder %s176_s28, %s176_s28 }
  0x12   : > { %p962_p11 = pnand %p664_p9, %p1097_p1  ;;  %p744_p7 = scmp.lt.s32.totalorder %s735_s7, %s735_s7 }
  0x14   : > { %p726_p12 = pneg %p962_p11  ;;  %p745_p10 = por %p744_p7, %p743_p5 }
  0x16   : > { %p738_p0 = pnand %p736_p13, %p726_p12 }
  0x18   : > { %p739_p3 = pneg %p738_p0 }
  0x1a   : > { %p746_p9 = pnand %p745_p10, %p739_p3 }
  0x1c   : > { %749 = shalt.err (!%p746_p9)
}
  0x1d   : > { %s876_s8 = smov 256   ;;  %s877_s9 = smov 16  }
  0x1e   : > { %667 = dma.hbm_to_vmem [thread:$0]  (!%p962_p11), %s1092_s1, 4096, %s176_s28, [#allocation6], %s876_s8, %s876_s8, %s877_s9  }
  0x1f   : > { %s761_s12 = scalar_lea.vmem %s192_s6, 4096  ;;  %p769_p2 = scmp.lt.s32.totalorder %s192_s6, %s192_s6 }
  0x20   : > { %p762_p1 = scmp.ne.s32.totalorder %s192_s6, %s761_s12  ;;  %p770_p6 = scmp.lt.s32.totalorder %s761_s12, %s761_s12 }
  0x22   : > { %p764_p13 = pnand %p762_p1, %p726_p12  ;;  %p771_p5 = por %p770_p6, %p769_p2 }
  0x24   : > { %p765_p0 = pneg %p764_p13 }
  0x26   : > { %p772_p10 = pnand %p771_p5, %p765_p0 }
  0x28   : > { %775 = shalt.err (!%p772_p10)
}
  0x29   : > { %s878_s13 = smov 128   ;;  %s879_s14 = smov 8  }
  0x2a   : > { %670 = dma.hbm_to_vmem [thread:$0]  (!%p962_p11), %s1094_s3, 4096, %s192_s6, [#allocation6], %s878_s13, %s878_s13, %s879_s14  }
  0x2b   : > { %s985_s17 = sadd.s32 1, %s872_s21   ;;  %s29_s27 = sadd.s32 1, %s868_s20 }
  0x2c   : > { %s26_s23 = ssub.s32 %s872_s21, %s985_s17  ;;  %p36_p2 = scmp.ne.s32.totalorder %s868_s20, %s864_s19 }
  0x2d   : > { %p27_p1 = scmp.eq.s32.totalorder %s26_s23, 0  ;;  %p37_p6 = scmp.eq.s32.totalorder %s872_s21, 0 }
  0x2e   : > { %p1105_p3 = scmp.eq.s32.totalorder %s934_s22, 1  ;;  %p681_p9 = scmp.lt.s32.totalorder %s872_s21, 2 }
  0x2f   : > { %s994_s28 = scalar_select %p27_p1, %s868_s20, %s29_s27  }
  0x30   : > { %p38_p12 = por %p37_p6, %p36_p2  ;;  %p998_p7 = por %p1105_p3, %p36_p2 }
  0x31   : > { %s208_s29 = sand.u32 1, %s868_s20   ;;  %s606_s6 = sshll.u32 %s872_s21, 7 }
  0x32   : > { %s1106_s30 = scalar_select %p998_p7, 1, 0 }
  0x33   : > { %s605_s7 = sshll.u32 %s208_s29, 3  ;;  %s1008_s10 = scalar_lea.hbm %s1091_s0, %s606_s6 }
  0x34   : > { %s212_s11 = scalar_lea.vmem [#allocation2], %s605_s7  ;;  %p1010_p11 = pnand %p681_p9, %p38_p12 }
  0x35   : > { %s219_s12 = sshll.u32 %s212_s11, 4  ;;  %s209_s14 = scalar_lea.sflag [#allocation3], %s208_s29  ;;  %s220_s12 = int_to_ptr.vmem [resolvable:$true] %s219_s12 }
  0x36   : > { %s776_s15 = scalar_lea.hbm %s1008_s10, 128  ;;  %p778_p0 = pneg %p1010_p11 }
  0x37   : > { %p777_p13 = scmp.ne.s32.totalorder %s1008_s10, %s776_s15  ;;  %s781_s27 = scalar_lea.hbm %s1091_s0, 256 }
  0x38   : > { %p782_p1 = scmp.lt.s32.totalorder %s1008_s10, %s1091_s0  ;;  %p783_p2 = scmp.lt.s32.totalorder %s781_s27, %s776_s15 }
  0x39   : > { %p779_p5 = pnand %p778_p0, %p777_p13 }
  0x3a   : > { %p784_p6 = por %p783_p2, %p782_p1 }
  0x3b   : > { %p780_p10 = pneg %p779_p5 }
  0x3d   : > { %p785_p12 = pnand %p784_p6, %p780_p10 }
  0x3f   : > { %788 = shalt.err (!%p785_p12)
}
  0x40   : > { %s789_s8 = scalar_lea.vmem %s220_s12, 128  ;;  %s880_s29 = smov [#allocation2]  }
  0x41   : > { %p790_p3 = scmp.ne.s32.totalorder %s220_s12, %s789_s8  ;;  %s794_s9 = sshll.u32 %s880_s29, 4  ;;  %s795_s9 = int_to_ptr.vmem [resolvable:$false] %s794_s9 }
  0x42   : > { %s796_s11 = scalar_lea.vmem %s795_s9, 256  ;;  %p797_p13 = scmp.lt.s32.totalorder %s220_s12, %s795_s9 }
  0x43   : > { %p792_p9 = pnand %p790_p3, %p778_p0  ;;  %p798_p5 = scmp.lt.s32.totalorder %s796_s11, %s789_s8 }
  0x45   : > { %p793_p7 = pneg %p792_p9  ;;  %p799_p4 = por %p798_p5, %p797_p13 }
  0x47   : > { %p800_p8 = pnand %p799_p4, %p793_p7 }
  0x49   : > { %803 = shalt.err (!%p800_p8)
}
  0x4a   : > { %674 = dma.hbm_to_vmem [thread:$0]  (!%p1010_p11), %s1008_s10, 128, %s220_s12, %s209_s14  }
  0x4b   : > { %p1108_p10 = scmp.ne.s32.totalorder %s1103_s26, 0 }
  0x4c   : > { %s1031_s15 = sand.u32 (!%p1108_p10), 1, %s864_s19   ;;  %p1109_p4 = scmp.ne.s32.totalorder (!%p1108_p10), %s1101_s24, 0 }
  0x4d   : > { %228 = sbr.rel (%p1108_p10) target bundleno = 531 (0x213), region = 40  ;;  %s608_s16 = sshll.u32 (!%p1108_p10), %s1031_s15, 3 }
  0x4e   : > { %s231_s23 = scalar_lea.sflag (!%p1108_p10), [#allocation3], %s1031_s15  ;;  %s1037_s27 = scalar_lea.vmem (!%p1108_p10), [#allocation2], %s608_s16 }
  0x52   : > { %847 = dma.done.wait (%p1109_p4), %s231_s23, 128  }
  0x53   : > { %849 = vsyncadd (%p1109_p4), %s231_s23, 4294967168  ;;  %p1110_p8 = scmp.eq.s32.totalorder %s934_s22, 0 }
  0x55   : > { %851 = dma.done.wait (%p1110_p8), [#allocation6], 8192   ;;  %p1111_p7 = pmov %p1110_p8 }
  0x56   : > { %v881_v0 = vmov 0.0   ;;  %v301_v1 = vld [vmem:[#allocation5 + $0xf8] sm:$0xff]  ;;  %v300_v2 = vld [vmem:[#allocation5 + $0xf0] sm:$0xff]  ;;  %v299_v3 = vld [vmem:[#allocation5 + $0xe8] sm:$0xff]  ;;  %s614_s13 = sshll.u32 %s934_s22, 7  ;;  %s268_s14 = scalar_lea.vmem [#allocation8], %s608_s16 }
  0x57   : > { %853 = vsyncadd (%p1111_p7), [#allocation6], 4294959104  ;;  %410 = vmatprep.mubr.f32.mxu0 %v881_v0  ;;  %346 = vmatprep.subr.mxu0 %v301_v1  ;;  %v298_v4 = vld [vmem:[#allocation5 + $0xe0] sm:$0xff]  ;;  %v297_v5 = vld [vmem:[#allocation5 + $0xd8] sm:$0xff]  ;;  %s511_s6 = sshll.u32 %s268_s14, 4  ;;  %s509_s29 = scalar_lea.hbm %s1096_s5, %s614_s13  ;;  %s512_s6 = int_to_ptr.vmem [resolvable:$true] %s511_s6 }
  0x58   : > { %347 = vmatpush1.msra.mxu0 %v300_v2  ;;  %v296_v6 = vld [vmem:[#allocation5 + $0xd0] sm:$0xff]  ;;  %v295_v7 = vld [vmem:[#allocation5 + $0xc8] sm:$0xff]  ;;  %v294_v8 = vld [vmem:[#allocation5 + $0xc0] sm:$0xff]  ;;  %v336_v2 = vlaneseq  ;;  %s498_s9 = scalar_lea.sflag [#allocation4], %s1031_s15  ;;  %s804_s11 = scalar_lea.vmem %s512_s6, 128 }
  0x59   : > { %348 = vmatprep.subr.mxu0 %v299_v3  ;;  %v293_v9 = vld [vmem:[#allocation5 + $0xb8] sm:$0xff]  ;;  %v292_v10 = vld [vmem:[#allocation5 + $0xb0] sm:$0xff]  ;;  %v291_v11 = vld [vmem:[#allocation5 + $0xa8] sm:$0xff]  ;;  %p805_p11 = scmp.ne.s32.totalorder %s512_s6, %s804_s11  ;;  %p1112_p0 = scmp.ne.s32.totalorder %s1106_s30, 0 }
  0x5a   : > { %349 = vmatpush1.msra.mxu0 %v298_v4  ;;  %v290_v12 = vld [vmem:[#allocation5 + $0xa0] sm:$0xff]  ;;  %v289_v13 = vld [vmem:[#allocation5 + $0x98] sm:$0xff]  ;;  %v288_v14 = vld [vmem:[#allocation5 + $0x90] sm:$0xff]  ;;  %v337_v3 = vshrl.u32 %v336_v2, 7  ;;  %s882_s23 = smov [#allocation8]  }
  0x5b   : > { %350 = vmatprep.subr.mxu0 %v297_v5  ;;  %v334_v15 = vld [vmem:[#allocation7 + $0xf8] sm:$0xff]  ;;  %v333_v17 = vld [vmem:[#allocation7 + $0xf0] sm:$0xff]  ;;  %v287_v18 = vld [vmem:[#allocation5 + $0x88] sm:$0xff]  ;;  %p806_p1 = pnand %p805_p11, %p1112_p0 }
  0x5c   : > { %351 = vmatpush1.msra.mxu0 %v296_v6  ;;  %v318_v16 = vld [vmem:[#allocation7 + $0x78] sm:$0xff]  ;;  %617 = vmatprep.subr.mxu1 %v334_v15  ;;  %v317_v19 = vld [vmem:[#allocation7 + $0x70] sm:$0xff]  ;;  %v286_v20 = vld [vmem:[#allocation5 + $0x80] sm:$0xff]  ;;  %v338_v4 = vsub.s32 0, %v337_v3  ;;  %v342_v6 = vsub.s32 1, %v337_v3 }
  0x5d   : > { %352 = vmatprep.subr.mxu0 %v295_v7  ;;  %618 = vmatpush3.msra.mxu1 %v318_v16  ;;  %v332_v21 = vld [vmem:[#allocation7 + $0xe8] sm:$0xff]  ;;  %v285_v22 = vld [vmem:[#allocation5 + $0x78] sm:$0xff]  ;;  %v284_v24 = vld [vmem:[#allocation5 + $0x70] sm:$0xff]  ;;  %p807_p2 = pneg %p806_p1 }
  0x5e   : > { %353 = vmatpush1.msra.mxu0 %v294_v8  ;;  %619 = vmatprep.subr.mxu1 %v333_v17  ;;  %v316_v23 = vld [vmem:[#allocation7 + $0x68] sm:$0xff]  ;;  %v331_v25 = vld [vmem:[#allocation7 + $0xe0] sm:$0xff]  ;;  %v330_v29 = vld [vmem:[#allocation7 + $0xd8] sm:$0xff] }
  0x5f   : > { %354 = vmatprep.subr.mxu0 %v293_v9  ;;  %620 = vmatpush3.msra.mxu1 %v317_v19  ;;  %v283_v26 = vld [vmem:[#allocation5 + $0x68] sm:$0xff]  ;;  %v315_v27 = vld [vmem:[#allocation7 + $0x60] sm:$0xff]  ;;  %v281_v30 = vld [vmem:[#allocation5 + $0x58] sm:$0xff] }
  0x60   : > { %355 = vmatpush1.msra.mxu0 %v292_v10  ;;  %621 = vmatprep.subr.mxu1 %v332_v21  ;;  %v282_v28 = vld [vmem:[#allocation5 + $0x60] sm:$0xff]  ;;  %v314_v31 = vld [vmem:[#allocation7 + $0x58] sm:$0xff]  ;;  %v280_v32 = vld [vmem:[#allocation5 + $0x50] sm:$0xff] }
  0x61   : > { %356 = vmatprep.subr.mxu0 %v291_v11  ;;  %622 = vmatpush3.msra.mxu1 %v316_v23  ;;  %v329_v33 = vld [vmem:[#allocation7 + $0xd0] sm:$0xff]  ;;  %v279_v34 = vld [vmem:[#allocation5 + $0x48] sm:$0xff]  ;;  %v278_v36 = vld [vmem:[#allocation5 + $0x40] sm:$0xff] }
  0x62   : > { %357 = vmatpush1.msra.mxu0 %v290_v12  ;;  %623 = vmatprep.subr.mxu1 %v331_v25  ;;  %v313_v35 = vld [vmem:[#allocation7 + $0x50] sm:$0xff]  ;;  %v328_v37 = vld [vmem:[#allocation7 + $0xc8] sm:$0xff]  ;;  %v277_v38 = vld [vmem:[#allocation5 + $0x38] sm:$0xff] }
  0x63   : > { %358 = vmatprep.subr.mxu0 %v289_v13  ;;  %624 = vmatpush3.msra.mxu1 %v315_v27  ;;  %v312_v39 = vld [vmem:[#allocation7 + $0x48] sm:$0xff]  ;;  %v276_v40 = vld [vmem:[#allocation5 + $0x30] sm:$0xff]  ;;  %v327_v41 = vld [vmem:[#allocation7 + $0xc0] sm:$0xff] }
  0x64   : > { %359 = vmatpush1.msra.mxu0 %v288_v14  ;;  %625 = vmatprep.subr.mxu1 %v330_v29  ;;  %v275_v42 = vld [vmem:[#allocation5 + $0x28] sm:$0xff]  ;;  %v311_v43 = vld [vmem:[#allocation7 + $0x40] sm:$0xff]  ;;  %v326_v45 = vld [vmem:[#allocation7 + $0xb8] sm:$0xff] }
  0x65   : > { %360 = vmatprep.subr.mxu0 %v287_v18  ;;  %626 = vmatpush3.msra.mxu1 %v314_v31  ;;  %v274_v44 = vld [vmem:[#allocation5 + $0x20] sm:$0xff]  ;;  %v273_v46 = vld [vmem:[#allocation5 + $0x18] sm:$0xff]  ;;  %v272_v48 = vld [vmem:[#allocation5 + $0x10] sm:$0xff] }
  0x66   : > { %361 = vmatpush1.msra.mxu0 %v286_v20  ;;  %627 = vmatprep.subr.mxu1 %v329_v33  ;;  %v310_v47 = vld [vmem:[#allocation7 + $0x38] sm:$0xff]  ;;  %v325_v49 = vld [vmem:[#allocation7 + $0xb0] sm:$0xff]  ;;  %v271_v50 = vld [vmem:[#allocation5 + $0x8] sm:$0xff] }
  0x67   : > { %362 = vmatprep.subr.mxu0 %v285_v22  ;;  %628 = vmatpush3.msra.mxu1 %v313_v35  ;;  %v309_v51 = vld [vmem:[#allocation7 + $0x30] sm:$0xff]  ;;  %v270_v52 = vld [vmem:[#allocation5] sm:$0xff]  ;;  %v324_v53 = vld [vmem:[#allocation7 + $0xa8] sm:$0xff] }
  0x68   : > { %363 = vmatpush1.msra.mxu0 %v284_v24  ;;  %629 = vmatprep.subr.mxu1 %v328_v37  ;;  %v269_v54 = vld [vmem:[%s1037_s27] sm:$0xff]  ;;  %v308_v55 = vld [vmem:[#allocation7 + $0x28] sm:$0xff]  ;;  %v323_v56 = vld [vmem:[#allocation7 + $0xa0] sm:$0xff]  ;;  %s808_s27 = sshll.u32 %s882_s23, 4  ;;  %s809_s27 = int_to_ptr.vmem [resolvable:$false] %s808_s27 }
  0x69   : > { %364 = vmatprep.subr.mxu0 %v283_v26  ;;  %630 = vmatpush3.msra.mxu1 %v312_v39  ;;  %v307_v57 = vld [vmem:[#allocation7 + $0x20] sm:$0xff]  ;;  %v322_v58 = vld [vmem:[#allocation7 + $0x98] sm:$0xff]  ;;  %v321_v60 = vld [vmem:[#allocation7 + $0x90] sm:$0xff]  ;;  %s810_s22 = scalar_lea.vmem %s809_s27, 256  ;;  %p811_p6 = scmp.lt.s32.totalorder %s512_s6, %s809_s27 }
  0x6a   : > { %365 = vmatpush1.msra.mxu0 %v282_v28  ;;  %631 = vmatprep.subr.mxu1 %v327_v41  ;;  %v306_v59 = vld [vmem:[#allocation7 + $0x18] sm:$0xff]  ;;  %v305_v61 = vld [vmem:[#allocation7 + $0x10] sm:$0xff]  ;;  %v320_v62 = vld [vmem:[#allocation7 + $0x88] sm:$0xff]  ;;  %p812_p12 = scmp.lt.s32.totalorder %s810_s22, %s804_s11 }
  0x6b   : > { %366 = vmatprep.subr.mxu0 %v281_v30  ;;  %632 = vmatpush3.msra.mxu1 %v311_v43  ;;  %v304_v63 = vld [vmem:[#allocation7 + $0x8] sm:$0xff]  ;;  %v319_v0 = vld [vmem:[#allocation7 + $0x80] sm:$0xff]  ;;  %v302_v5 = vld [vmem:[%s1093_s2] sm:$0x3] }
  0x6c   : > { %367 = vmatpush1.msra.mxu0 %v280_v32  ;;  %633 = vmatprep.subr.mxu1 %v326_v45  ;;  %v303_v1 = vld [vmem:[#allocation7] sm:$0xff]  ;;  %v339_v7 = vrot.slane %v302_v5, %v338_v4  ;;  %v343_v8 = vrot.slane %v302_v5, %v342_v6  ;;  %v612_v16 = vld [vmem:[%s1095_s4] ss:$0 sm:$0xff]  ;;  %p813_p3 = por %p812_p12, %p811_p6 }
  0x6d   : > { %368 = vmatprep.subr.mxu0 %v279_v34  ;;  %634 = vmatpush3.msra.mxu1 %v310_v47 }
  0x6e   : > { %369 = vmatpush1.msra.mxu0 %v278_v36  ;;  %635 = vmatprep.subr.mxu1 %v325_v49  ;;  %p814_p9 = pnand %p813_p3, %p807_p2 }
  0x6f   : > { %370 = vmatprep.subr.mxu0 %v277_v38  ;;  %636 = vmatpush3.msra.mxu1 %v309_v51 }
  0x70   : > { %371 = vmatpush1.msra.mxu0 %v276_v40  ;;  %637 = vmatprep.subr.mxu1 %v324_v53 }
  0x71   : > { %372 = vmatprep.subr.mxu0 %v275_v42  ;;  %638 = vmatpush3.msra.mxu1 %v308_v55 }
  0x72   : > { %373 = vmatpush1.msra.mxu0 %v274_v44  ;;  %639 = vmatprep.subr.mxu1 %v323_v56 }
  0x73   : > { %374 = vmatprep.subr.mxu0 %v273_v46  ;;  %640 = vmatpush3.msra.mxu1 %v307_v57 }
  0x74   : > { %375 = vmatpush1.msra.mxu0 %v272_v48  ;;  %641 = vmatprep.subr.mxu1 %v322_v58 }
  0x75   : > { %376 = vmatprep.subr.mxu0 %v271_v50  ;;  %642 = vmatpush3.msra.mxu1 %v306_v59 }
  0x76   : > { %377 = vmatpush1.msra.mxu0 %v270_v52  ;;  %643 = vmatprep.subr.mxu1 %v321_v60 }
  0x77   : > { %411 = vmatmul.mubr.f32.vlgmr.msra.gmra.mxu0 %v269_v54  ;;  %644 = vmatpush3.msra.mxu1 %v305_v61 }
  0x78   : > { %645 = vmatprep.subr.mxu1 %v320_v62 }
  0x79   : > { %646 = vmatpush3.msra.mxu1 %v304_v63 }
  0x7a   : > { %647 = vmatprep.subr.mxu1 %v319_v0 }
  0x7b   : > { %648 = vmatpush3.msra.mxu1 %v303_v1 }
 0x137   : > { %v412_v9 = vpop.f32.mrf.mxu0 }
 0x138   : > { %v413_v10 = vadd.f32 %v412_v9, %v339_v7 }
 0x139   : > { %v414_v11 = vpop.f32.mrf.mxu0 }
 0x13a   : > { %v415_v12 = vadd.f32 %v414_v11, %v343_v8  ;;  %v417_v14 = vmax.f32 %v413_v10, 0.0 }
 0x13c   : > { %v418_v13 = vmax.f32 %v415_v12, 0.0 }
 0x13e   : > { %490 = vmatprep.mubr.f32.mxu1 %v418_v13 }
 0x13f   : > { %491 = vmatmul.mubr.f32.vlgmr.msra.gmra.mxu1 %v417_v14 }
 0x1ff   : > { %v649_v15 = vpop.f32.mrf.mxu1 }
 0x201   : > { %v650_v17 = vpop.f32.mrf.mxu1 }
 0x202   : > { %v651_v18 = vadd.f32 %v650_v17, %v649_v15 }
 0x204   : > { %v493_v19 = vadd.f32 %v651_v18, %v612_v16 }
 0x206   : > { %496 = vst [vmem:[%s268_s14] sm:$0xff] %v493_v19 }
 0x207   : > { %817 = shalt.err (!%p814_p9)
}
 0x208   : > { %s818_s16 = scalar_lea.hbm %s509_s29, 128  ;;  %s822_s26 = scalar_lea.hbm %s1096_s5, 256 }
 0x209   : > { %p819_p13 = scmp.ne.s32.totalorder %s509_s29, %s818_s16  ;;  %p823_p4 = scmp.lt.s32.totalorder %s509_s29, %s1096_s5 }
 0x20a   : > { %p824_p8 = scmp.lt.s32.totalorder %s822_s26, %s818_s16 }
 0x20b   : > { %p820_p5 = pnand %p819_p13, %p1112_p0 }
 0x20c   : > { %p825_p7 = por %p824_p8, %p823_p4 }
 0x20d   : > { %p821_p10 = pneg %p820_p5 }
 0x20f   : > { %p826_p11 = pnand %p825_p7, %p821_p10 }
 0x211   : > { %829 = shalt.err (!%p826_p11)
}
 0x212   : > { %662 = dma.vmem_to_hbm [thread:$0]  (%p1112_p0), %s512_s6, 128, %s509_s29, %s498_s9  }
 0x213 PF: > { %s523_s13 = sand.u32 1, %s860_s18   ;;  %p1113_p1 = scmp.ne.s32.totalorder %s1102_s25, 0 }
 0x214   : > { %p1114_p2 = scmp.ge.s32.totalorder %s872_s21, 2  ;;  %s524_s14 = scalar_lea.sflag [#allocation4], %s523_s13 }
 0x216   : > { %p676_p6 = pnand %p1114_p2, %p1113_p1 }
 0x218   : > { %p677_p12 = pneg %p676_p6 }
 0x21a   : > { %855 = dma.done.wait (%p677_p12), %s524_s14, 128  }
 0x21b   : > { %857 = vsyncadd (%p677_p12), %s524_s14, 4294967168  ;;  %p19_p3 = scmp.ge.s32.totalorder %s985_s17, 4   ;;  %s1115_s18 = smov %s864_s19 }
 0x21c   : > { %s1116_s19 = smov %s868_s20  ;;  %s1117_s20 = smov %s994_s28 }
 0x21d   : > { %s1118_s21 = smov %s985_s17  ;;  %21 = sbr.rel (!%p19_p3) target bundleno = 6 (0x6), region = 93 }
 0x222   :  { %529 = vsyncpa [#allocation3], 1 }
 0x223   :  { %531 = vsyncpa [#allocation3 + $0x1], 1 }
 0x224   :  { %532 = vsyncpa [#allocation6], 1 }
 0x225   :  { %533 = vsyncpa [#allocation4], 1 }
 0x226   :  { %535 = vsyncpa [#allocation4 + $0x1], 1 }

</bundles_post_ra>
